<compile_context>
chip_gen: v7x
topology: tpu7x:2x2x1
jax: 0.10.0
libtpu: 0.0.40
codegen_flags: <defaults>
</compile_context>

<pallas_src>
import functools

import jax
import jax.numpy as jnp
from jax import lax
from jax.experimental import pallas as pl
from jax.experimental.pallas import tpu as pltpu

LANE = 128
SUBLANE = 8


def _round_up(x, m):
    return ((x + m - 1) // m) * m


# ----------------------------------------------------------------------------
# Kernel
# ----------------------------------------------------------------------------
def _predictor_kernel(n_layers, has_feature, *refs):
    # refs = [h_ref, w0, b0, w1, b1, ..., (wf, bf)?, out_ref]
    h_ref = refs[0]
    out_ref = refs[-1]
    params = refs[1:-1]

    h = h_ref[...].astype(jnp.float32)

    idx = 0
    for i in range(n_layers):
        w = params[idx][...]          # (in_pad, out_pad)
        b = params[idx + 1][...]      # (1, out_pad)
        idx += 2
        h = jnp.dot(h, w, preferred_element_type=jnp.float32) + b
        if i != n_layers - 1:
            h = jnp.maximum(h, 0.0)

    if has_feature:
        w = params[idx][...]
        b = params[idx + 1][...]
        h = jnp.maximum(h, 0.0)
        h = jnp.dot(h, w, preferred_element_type=jnp.float32) + b

    # F.normalize: h / clamp_min(||h||_2, 1e-12)  ==  h * rsqrt(max(sum h^2, 1e-24))
    sumsq = jnp.sum(h * h, axis=-1, keepdims=True)
    inv = lax.rsqrt(jnp.maximum(sumsq, 1e-24))
    out_ref[...] = (h * inv).astype(out_ref.dtype)


# ----------------------------------------------------------------------------
# Parameter preparation (done once, outside the hot path)
# ----------------------------------------------------------------------------
def weight_norm_effective(v, g):
    # PyTorch weight_norm on Linear: W[o, i] = g[o] * v[o, i] / ||v[o, :]||
    row_norm = jnp.sqrt(jnp.sum(v * v, axis=1, keepdims=True))
    return g[:, None] * v / row_norm


def _pad_linear(v, g, b):
    """Effective transposed weight (in, out) and bias (1, out), zero-padded to 128."""
    w = weight_norm_effective(v, g).T                      # (in, out)
    fin, fout = w.shape
    fin_p, fout_p = _round_up(fin, LANE), _round_up(fout, LANE)
    w_p = jnp.zeros((fin_p, fout_p), jnp.float32).at[:fin, :fout].set(w)
    b_p = jnp.zeros((1, fout_p), jnp.float32).at[0, :fout].set(b)
    return w_p, b_p


def prepare_predictor_params(layer_params, feature_params):
    """Resolve weight-norm + transpose + lane padding once per parameter update."""
    weights, biases = [], []
    for (v, g, b) in layer_params:
        w_p, b_p = _pad_linear(v, g, b)
        weights.append(w_p)
        biases.append(b_p)
    has_feature = feature_params is not None
    if has_feature:
        w_p, b_p = _pad_linear(*feature_params)
        weights.append(w_p)
        biases.append(b_p)
    out_dim = (feature_params[0].shape[0] if has_feature
               else layer_params[-1][0].shape[0])
    return weights, biases, has_feature, out_dim


# ----------------------------------------------------------------------------
# Forward wrapper
# ----------------------------------------------------------------------------
def predictor_forward(h, weights, biases, *, has_feature, out_dim, tb=None):
    """h: (B, in_size) f32.  weights[i]: (fin_pad, fout_pad), biases[i]: (1, fout_pad)."""
    B, in_size = h.shape
    in_pad = weights[0].shape[0]
    out_pad = weights[-1].shape[1]

    # Batch tile: multiple of 8 sublanes, capped at 128 rows per grid step.
    if tb is None:
        tb = 128 if B >= 128 else _round_up(max(B, 1), SUBLANE)
    B_pad = _round_up(B, tb)
    n_tiles = B_pad // tb

    # Zero-pad activations to the lane-dense padded shapes.
    h_p = jnp.zeros((B_pad, in_pad), jnp.float32).at[:B, :in_size].set(
        h.astype(jnp.float32))

    n_layers = len(weights) - (1 if has_feature else 0)
    kernel = functools.partial(_predictor_kernel, n_layers, has_feature)

    kernel_inputs = [h_p]
    in_specs = [pl.BlockSpec((tb, in_pad), lambda i: (i, 0))]
    for w, b in zip(weights, biases):
        kernel_inputs.append(w)
        kernel_inputs.append(b)
        # Constant block index -> weights stay VMEM-resident across the grid.
        in_specs.append(pl.BlockSpec(w.shape, lambda i: (0, 0)))
        in_specs.append(pl.BlockSpec(b.shape, lambda i: (0, 0)))

    # Cost estimate for XLA scheduling around the custom call.
    flops = 2 * B_pad * sum(w.shape[0] * w.shape[1] for w in weights)
    bytes_accessed = 4 * (h_p.size
                          + sum(w.size + b.size for w, b in zip(weights, biases))
                          + B_pad * out_pad)
    cost = pl.CostEstimate(flops=flops, transcendentals=B_pad,
                           bytes_accessed=bytes_accessed)

    # VMEM budget: resident params + double-buffered in/out activation tiles
    # + headroom for live intermediates.  Clamp to a range safe on v5e/v6e/v7x.
    param_bytes = 4 * sum(w.size + b.size for w, b in zip(weights, biases))
    stream_bytes = 2 * 4 * tb * (in_pad + out_pad)
    inter_bytes = 4 * 4 * tb * max(w.shape[1] for w in weights)
    vmem_bytes = int(min(max(2 * (param_bytes + stream_bytes + inter_bytes),
                             8 << 20), 32 << 20))

    out_p = pl.pallas_call(
        kernel,
        out_shape=jax.ShapeDtypeStruct((B_pad, out_pad), jnp.float32),
        grid=(n_tiles,),
        in_specs=in_specs,
        out_specs=pl.BlockSpec((tb, out_pad), lambda i: (i, 0)),
        compiler_params=pltpu.CompilerParams(
            dimension_semantics=("parallel",),
            vmem_limit_bytes=vmem_bytes),
        cost_estimate=cost,
    )(*kernel_inputs)

    return out_p[:B, :out_dim]


# ----------------------------------------------------------------------------
# Test harness
# ----------------------------------------------------------------------------
def make_params(key, in_size, hidden_size, layer_num, feature_size):
    layer_params = []
    for i in range(layer_num):
        fin = in_size if i == 0 else hidden_size
        key, k1, k2, k3 = jax.random.split(key, 4)
        v = jax.random.normal(k1, (hidden_size, fin), jnp.float32) * 0.1
        g = jax.random.normal(k2, (hidden_size,), jnp.float32) * 0.1 + 1.0
        b = jax.random.normal(k3, (hidden_size,), jnp.float32) * 0.1
        layer_params.append((v, g, b))
    feature_params = None
    if feature_size is not None:
        key, k1, k2, k3 = jax.random.split(key, 4)
        v = jax.random.normal(k1, (feature_size, hidden_size), jnp.float32) * 0.1
        g = jax.random.normal(k2, (feature_size,), jnp.float32) * 0.1 + 1.0
        b = jax.random.normal(k3, (feature_size,), jnp.float32) * 0.1
        feature_params = (v, g, b)
    return layer_params, feature_params


def reference_forward(h, layer_params, feature_params):
    # Pure-JAX reference mirroring the PyTorch module.
    layer_num = len(layer_params)
    for i, (v, g, b) in enumerate(layer_params):
        w = weight_norm_effective(v, g)
        h = h @ w.T + b
        if i != layer_num - 1:
            h = jnp.maximum(h, 0.0)
    if feature_params is not None:
        v, g, b = feature_params
        w = weight_norm_effective(v, g)
        h = jnp.maximum(h, 0.0)
        h = h @ w.T + b
    norm = jnp.sqrt(jnp.sum(h * h, axis=-1, keepdims=True))
    return h / jnp.maximum(norm, 1e-12)


if __name__ == "__main__":
    key = jax.random.PRNGKey(0)
    B, in_size, hidden_size, layer_num, feature_size = 8, 24, 32, 3, 16

    key, kh, kp = jax.random.split(key, 3)
    h = jax.random.normal(kh, (B, in_size), jnp.float32)
    layer_params, feature_params = make_params(
        kp, in_size, hidden_size, layer_num, feature_size)

    # Hoist weight-norm / transpose / padding out of the per-call path.
    weights, biases, has_feature, out_dim = prepare_predictor_params(
        layer_params, feature_params)
    weights = [jax.block_until_ready(w) for w in weights]
    biases = [jax.block_until_ready(b) for b in biases]

    fwd = jax.jit(functools.partial(
        predictor_forward, has_feature=has_feature, out_dim=out_dim))

    out = fwd(h, weights, biases)
    out = jax.block_until_ready(out)

    ref = reference_forward(h, layer_params, feature_params)
    assert out.shape == (B, feature_size), out.shape
    assert jnp.allclose(out, ref, atol=1e-5, rtol=1e-5), "mismatch vs reference"

    print("KERNEL_OK")
</pallas_src>

<mosaic_0001>
module attributes {stable_mosaic.version = 11 : i64} {
  func.func @_predictor_kernel(%arg0: i32, %arg1: memref<8x128xf32, #tpu.memory_space<vmem>>, %arg2: memref<128x128xf32, #tpu.memory_space<vmem>>, %arg3: memref<1x128xf32, #tpu.memory_space<vmem>>, %arg4: memref<128x128xf32, #tpu.memory_space<vmem>>, %arg5: memref<1x128xf32, #tpu.memory_space<vmem>>, %arg6: memref<128x128xf32, #tpu.memory_space<vmem>>, %arg7: memref<1x128xf32, #tpu.memory_space<vmem>>, %arg8: memref<128x128xf32, #tpu.memory_space<vmem>>, %arg9: memref<1x128xf32, #tpu.memory_space<vmem>>, %arg10: memref<8x128xf32, #tpu.memory_space<vmem>>) attributes {dimension_semantics = [#tpu.dimension_semantics<parallel>], iteration_bounds = array<i64: 1>, scalar_prefetch = 0 : i64, scratch_operands = 0 : i64, tpu.core_type = #tpu.core_type<tc>, window_params = [{transform_indices = @transform_0, window_bounds = array<i64: 8, 128>}, {pipeline_mode = #tpu.pipeline_mode<synchronous>, transform_indices = @transform_1, window_bounds = array<i64: 128, 128>}, {pipeline_mode = #tpu.pipeline_mode<synchronous>, transform_indices = @transform_2, window_bounds = array<i64: 1, 128>}, {pipeline_mode = #tpu.pipeline_mode<synchronous>, transform_indices = @transform_3, window_bounds = array<i64: 128, 128>}, {pipeline_mode = #tpu.pipeline_mode<synchronous>, transform_indices = @transform_4, window_bounds = array<i64: 1, 128>}, {pipeline_mode = #tpu.pipeline_mode<synchronous>, transform_indices = @transform_5, window_bounds = array<i64: 128, 128>}, {pipeline_mode = #tpu.pipeline_mode<synchronous>, transform_indices = @transform_6, window_bounds = array<i64: 1, 128>}, {pipeline_mode = #tpu.pipeline_mode<synchronous>, transform_indices = @transform_7, window_bounds = array<i64: 128, 128>}, {pipeline_mode = #tpu.pipeline_mode<synchronous>, transform_indices = @transform_8, window_bounds = array<i64: 1, 128>}, {transform_indices = @transform_9, window_bounds = array<i64: 8, 128>}]} {
    %c0 = arith.constant 0 : index
    %c0_0 = arith.constant 0 : index
    %0 = vector.load %arg1[%c0, %c0_0] : memref<8x128xf32, #tpu.memory_space<vmem>>, vector<8x128xf32>
    %c0_1 = arith.constant 0 : index
    %c0_2 = arith.constant 0 : index
    %1 = vector.load %arg2[%c0_1, %c0_2] : memref<128x128xf32, #tpu.memory_space<vmem>>, vector<128x128xf32>
    %c0_3 = arith.constant 0 : index
    %c0_4 = arith.constant 0 : index
    %2 = vector.load %arg3[%c0_3, %c0_4] : memref<1x128xf32, #tpu.memory_space<vmem>>, vector<1x128xf32>
    %cst = arith.constant dense<0.000000e+00> : vector<8x128xf32>
    %3 = tpu.matmul %0, %1, %cst {dimension_numbers = #tpu.dot_dimension_numbers<[1], [0], [0], [1], [0, 0, 1, 1], [], []>} : vector<8x128xf32>, vector<128x128xf32>, vector<8x128xf32> -> vector<8x128xf32>
    %4 = vector.broadcast %2 : vector<1x128xf32> to vector<8x128xf32>
    %5 = arith.addf %3, %4 : vector<8x128xf32>
    %cst_5 = arith.constant 0.000000e+00 : f32
    %6 = vector.broadcast %cst_5 : f32 to vector<8x128xf32>
    %7 = arith.maximumf %5, %6 : vector<8x128xf32>
    %c0_6 = arith.constant 0 : index
    %c0_7 = arith.constant 0 : index
    %8 = vector.load %arg4[%c0_6, %c0_7] : memref<128x128xf32, #tpu.memory_space<vmem>>, vector<128x128xf32>
    %c0_8 = arith.constant 0 : index
    %c0_9 = arith.constant 0 : index
    %9 = vector.load %arg5[%c0_8, %c0_9] : memref<1x128xf32, #tpu.memory_space<vmem>>, vector<1x128xf32>
    %cst_10 = arith.constant dense<0.000000e+00> : vector<8x128xf32>
    %10 = tpu.matmul %7, %8, %cst_10 {dimension_numbers = #tpu.dot_dimension_numbers<[1], [0], [0], [1], [0, 0, 1, 1], [], []>} : vector<8x128xf32>, vector<128x128xf32>, vector<8x128xf32> -> vector<8x128xf32>
    %11 = vector.broadcast %9 : vector<1x128xf32> to vector<8x128xf32>
    %12 = arith.addf %10, %11 : vector<8x128xf32>
    %cst_11 = arith.constant 0.000000e+00 : f32
    %13 = vector.broadcast %cst_11 : f32 to vector<8x128xf32>
    %14 = arith.maximumf %12, %13 : vector<8x128xf32>
    %c0_12 = arith.constant 0 : index
    %c0_13 = arith.constant 0 : index
    %15 = vector.load %arg6[%c0_12, %c0_13] : memref<128x128xf32, #tpu.memory_space<vmem>>, vector<128x128xf32>
    %c0_14 = arith.constant 0 : index
    %c0_15 = arith.constant 0 : index
    %16 = vector.load %arg7[%c0_14, %c0_15] : memref<1x128xf32, #tpu.memory_space<vmem>>, vector<1x128xf32>
    %cst_16 = arith.constant dense<0.000000e+00> : vector<8x128xf32>
    %17 = tpu.matmul %14, %15, %cst_16 {dimension_numbers = #tpu.dot_dimension_numbers<[1], [0], [0], [1], [0, 0, 1, 1], [], []>} : vector<8x128xf32>, vector<128x128xf32>, vector<8x128xf32> -> vector<8x128xf32>
    %18 = vector.broadcast %16 : vector<1x128xf32> to vector<8x128xf32>
    %19 = arith.addf %17, %18 : vector<8x128xf32>
    %c0_17 = arith.constant 0 : index
    %c0_18 = arith.constant 0 : index
    %20 = vector.load %arg8[%c0_17, %c0_18] : memref<128x128xf32, #tpu.memory_space<vmem>>, vector<128x128xf32>
    %c0_19 = arith.constant 0 : index
    %c0_20 = arith.constant 0 : index
    %21 = vector.load %arg9[%c0_19, %c0_20] : memref<1x128xf32, #tpu.memory_space<vmem>>, vector<1x128xf32>
    %cst_21 = arith.constant 0.000000e+00 : f32
    %22 = vector.broadcast %cst_21 : f32 to vector<8x128xf32>
    %23 = arith.maximumf %19, %22 : vector<8x128xf32>
    %cst_22 = arith.constant dense<0.000000e+00> : vector<8x128xf32>
    %24 = tpu.matmul %23, %20, %cst_22 {dimension_numbers = #tpu.dot_dimension_numbers<[1], [0], [0], [1], [0, 0, 1, 1], [], []>} : vector<8x128xf32>, vector<128x128xf32>, vector<8x128xf32> -> vector<8x128xf32>
    %25 = vector.broadcast %21 : vector<1x128xf32> to vector<8x128xf32>
    %26 = arith.addf %24, %25 : vector<8x128xf32>
    %27 = arith.mulf %26, %26 : vector<8x128xf32>
    %cst_23 = arith.constant dense<0.000000e+00> : vector<8xf32>
    %28 = vector.multi_reduction <add>, %27, %cst_23 [1] : vector<8x128xf32> to vector<8xf32>
    %29 = vector.shape_cast %28 : vector<8xf32> to vector<8x1xf32>
    %cst_24 = arith.constant 1.000000e-24 : f32
    %30 = vector.broadcast %cst_24 : f32 to vector<8x1xf32>
    %31 = arith.maximumf %29, %30 : vector<8x1xf32>
    %32 = math.rsqrt %31 : vector<8x1xf32>
    %33 = vector.broadcast %32 : vector<8x1xf32> to vector<8x128xf32>
    %34 = arith.mulf %26, %33 : vector<8x128xf32>
    %c0_25 = arith.constant 0 : index
    %c0_26 = arith.constant 0 : index
    %35 = vector.load %arg10[%c0_25, %c0_26] : memref<8x128xf32, #tpu.memory_space<vmem>>, vector<8x128xf32>
    tpu.vector_store %arg10[%c0_25, %c0_26], %34 {strides = array<i32>} : memref<8x128xf32, #tpu.memory_space<vmem>>, vector<8x128xf32>,
    return
  }
  func.func @transform_0(%arg0: i32) -> (i32, i32) {
    %c0_i32 = arith.constant 0 : i32
    %c0_i32_0 = arith.constant 0 : i32
    return %arg0, %c0_i32 : i32, i32
  }
  func.func @transform_1(%arg0: i32) -> (i32, i32) {
    %c0_i32 = arith.constant 0 : i32
    %c0_i32_0 = arith.constant 0 : i32
    %c0_i32_1 = arith.constant 0 : i32
    return %c0_i32, %c0_i32_0 : i32, i32
  }
  func.func @transform_2(%arg0: i32) -> (i32, i32) {
    %c0_i32 = arith.constant 0 : i32
    %c0_i32_0 = arith.constant 0 : i32
    %c0_i32_1 = arith.constant 0 : i32
    return %c0_i32, %c0_i32_0 : i32, i32
  }
  func.func @transform_3(%arg0: i32) -> (i32, i32) {
    %c0_i32 = arith.constant 0 : i32
    %c0_i32_0 = arith.constant 0 : i32
    %c0_i32_1 = arith.constant 0 : i32
    return %c0_i32, %c0_i32_0 : i32, i32
  }
  func.func @transform_4(%arg0: i32) -> (i32, i32) {
    %c0_i32 = arith.constant 0 : i32
    %c0_i32_0 = arith.constant 0 : i32
    %c0_i32_1 = arith.constant 0 : i32
    return %c0_i32, %c0_i32_0 : i32, i32
  }
  func.func @transform_5(%arg0: i32) -> (i32, i32) {
    %c0_i32 = arith.constant 0 : i32
    %c0_i32_0 = arith.constant 0 : i32
    %c0_i32_1 = arith.constant 0 : i32
    return %c0_i32, %c0_i32_0 : i32, i32
  }
  func.func @transform_6(%arg0: i32) -> (i32, i32) {
    %c0_i32 = arith.constant 0 : i32
    %c0_i32_0 = arith.constant 0 : i32
    %c0_i32_1 = arith.constant 0 : i32
    return %c0_i32, %c0_i32_0 : i32, i32
  }
  func.func @transform_7(%arg0: i32) -> (i32, i32) {
    %c0_i32 = arith.constant 0 : i32
    %c0_i32_0 = arith.constant 0 : i32
    %c0_i32_1 = arith.constant 0 : i32
    return %c0_i32, %c0_i32_0 : i32, i32
  }
  func.func @transform_8(%arg0: i32) -> (i32, i32) {
    %c0_i32 = arith.constant 0 : i32
    %c0_i32_0 = arith.constant 0 : i32
    %c0_i32_1 = arith.constant 0 : i32
    return %c0_i32, %c0_i32_0 : i32, i32
  }
  func.func @transform_9(%arg0: i32) -> (i32, i32) {
    %c0_i32 = arith.constant 0 : i32
    %c0_i32_0 = arith.constant 0 : i32
    return %arg0, %c0_i32 : i32, i32
  }
}

</mosaic_0001>

<bundles_post_ra>
// kernel: predictor_forward.1
= control target key start
LH: loop header
LB: loop body
LE: loop exit
PB: predicated region body
PF: predicated region fallthrough
CT: control target
= control target key end

     0   :  { %14 = vsyncpa [#allocation3], 0  ;;  %s1127_s0 = inlined_call_operand.vmem [shape: f32[8,128], index: 0, kind: input, shape index: {}]   ;;  %s1128_s1 = inlined_call_operand.hbm [shape: f32[128,128], index: 1, kind: input, shape index: {}]   ;;  %s1129_s2 = inlined_call_operand.vmem [shape: f32[1,128], index: 2, kind: input, shape index: {}]   ;;  %s1130_s3 = inlined_call_operand.hbm [shape: f32[128,128], index: 3, kind: input, shape index: {}]   ;;  %s1131_s4 = inlined_call_operand.vmem [shape: f32[1,128], index: 4, kind: input, shape index: {}]   ;;  %s1132_s5 = inlined_call_operand.hbm [shape: f32[128,128], index: 5, kind: input, shape index: {}]   ;;  %s1133_s6 = inlined_call_operand.vmem [shape: f32[1,128], index: 6, kind: input, shape index: {}]   ;;  %s1134_s7 = inlined_call_operand.hbm [shape: f32[128,128], index: 7, kind: input, shape index: {}]   ;;  %s1135_s8 = inlined_call_operand.vmem [shape: f32[1,128], index: 8, kind: input, shape index: {}]   ;;  %s1136_s9 = inlined_call_operand.hbm [shape: f32[8,128], index: 9, kind: output, shape index: {}]  }
   0x1   :  { %15 = vsyncpa [#allocation6], 0 }
   0x2   :  { %16 = vsyncpa [#allocation9], 0 }
   0x3   :  { %17 = vsyncpa [#allocation4], 0  ;;  %s926_s30 = smov [#allocation5]   ;;  %s927_s11 = smov [#allocation2]  }
   0x4   :  { %s39_s10 = sshll.u32 %s926_s30, 4  ;;  %s25_s12 = sshll.u32 %s927_s11, 4  ;;  %s40_s10 = int_to_ptr.vmem [resolvable:$true] %s39_s10  ;;  %s986_s12 = int_to_ptr.vmem [resolvable:$true] %s25_s12 }
   0x5   :  { %s808_s15 = scalar_lea.hbm %s1130_s3, 2048 }
   0x6   :  { %p809_p0 = scmp.ne.s32.totalorder %s1130_s3, %s808_s15  ;;  %p812_p1 = scmp.lt.u32.totalorder %s808_s15, %s1130_s3 }
   0x8   :  { %p814_p2 = pnand %p812_p1, %p809_p0 }
   0xa   :  { %817 = shalt.err (!%p814_p2)
}
   0xb   :  { %s818_s20 = scalar_lea.vmem %s40_s10, 2048  ;;  %p823_p4 = scmp.lt.s32.totalorder %s40_s10, %s40_s10 }
   0xc   :  { %p819_p3 = scmp.ne.s32.totalorder %s40_s10, %s818_s20  ;;  %p824_p5 = scmp.lt.s32.totalorder %s818_s20, %s818_s20 }
   0xe   :  { %p825_p6 = por %p824_p5, %p823_p4 }
  0x10   :  { %p826_p7 = pnand %p825_p6, %p819_p3 }
  0x12   :  { %829 = shalt.err (!%p826_p7)
}
  0x13   :  { %s928_s21 = smov 128   ;;  %s929_s22 = smov 8  }
  0x14   :  { %45 = dma.hbm_to_vmem [thread:$0]  %s1130_s3, 2048, %s40_s10, [#allocation6], %s928_s21, %s928_s21, %s929_s22  }
  0x15   :  { %s830_s27 = scalar_lea.hbm %s1128_s1, 2048 }
  0x16   :  { %p831_p8 = scmp.ne.s32.totalorder %s1128_s1, %s830_s27  ;;  %p834_p9 = scmp.lt.u32.totalorder %s830_s27, %s1128_s1 }
  0x18   :  { %p836_p10 = pnand %p834_p9, %p831_p8 }
  0x1a   :  { %839 = shalt.err (!%p836_p10)
}
  0x1b   :  { %s840_s13 = scalar_lea.vmem %s986_s12, 2048  ;;  %p845_p12 = scmp.lt.s32.totalorder %s986_s12, %s986_s12 }
  0x1c   :  { %p841_p11 = scmp.ne.s32.totalorder %s986_s12, %s840_s13  ;;  %p846_p13 = scmp.lt.s32.totalorder %s840_s13, %s840_s13 }
  0x1e   :  { %p847_p0 = por %p846_p13, %p845_p12 }
  0x20   :  { %p848_p1 = pnand %p847_p0, %p841_p11 }
  0x22   :  { %851 = shalt.err (!%p848_p1)
}
  0x23   :  { %31 = dma.hbm_to_vmem [thread:$0]  %s1128_s1, 2048, %s986_s12, [#allocation3], %s928_s21, %s928_s21, %s929_s22  }
  0x24   :  { %s930_s14 = smov [#allocation7]   ;;  %s931_s16 = smov [#allocation8]  }
  0x25   :  { %s53_s15 = sshll.u32 %s930_s14, 4  ;;  %s67_s17 = sshll.u32 %s931_s16, 4  ;;  %s54_s15 = int_to_ptr.vmem [resolvable:$true] %s53_s15  ;;  %s1023_s17 = int_to_ptr.vmem [resolvable:$true] %s67_s17 }
  0x26   :  { %s852_s20 = scalar_lea.hbm %s1132_s5, 2048 }
  0x27   :  { %p853_p2 = scmp.ne.s32.totalorder %s1132_s5, %s852_s20  ;;  %p856_p3 = scmp.lt.u32.totalorder %s852_s20, %s1132_s5 }
  0x29   :  { %p858_p4 = pnand %p856_p3, %p853_p2 }
  0x2b   :  { %861 = shalt.err (!%p858_p4)
}
  0x2c   :  { %s862_s1 = scalar_lea.vmem %s54_s15, 2048  ;;  %p867_p6 = scmp.lt.s32.totalorder %s54_s15, %s54_s15 }
  0x2d   :  { %p863_p5 = scmp.ne.s32.totalorder %s54_s15, %s862_s1  ;;  %p868_p7 = scmp.lt.s32.totalorder %s862_s1, %s862_s1 }
  0x2f   :  { %p869_p8 = por %p868_p7, %p867_p6 }
  0x31   :  { %p870_p9 = pnand %p869_p8, %p863_p5 }
  0x33   :  { %873 = shalt.err (!%p870_p9)
}
  0x34   :  { %59 = dma.hbm_to_vmem [thread:$0]  %s1132_s5, 2048, %s54_s15, [#allocation6], %s928_s21, %s928_s21, %s929_s22  }
  0x35   :  { %s874_s30 = scalar_lea.hbm %s1134_s7, 2048 }
  0x36   :  { %p875_p10 = scmp.ne.s32.totalorder %s1134_s7, %s874_s30  ;;  %p878_p11 = scmp.lt.u32.totalorder %s874_s30, %s1134_s7 }
  0x38   :  { %p880_p12 = pnand %p878_p11, %p875_p10 }
  0x3a   :  { %883 = shalt.err (!%p880_p12)
}
  0x3b   :  { %s884_s14 = scalar_lea.vmem %s1023_s17, 2048  ;;  %p889_p0 = scmp.lt.s32.totalorder %s1023_s17, %s1023_s17 }
  0x3c   :  { %p885_p13 = scmp.ne.s32.totalorder %s1023_s17, %s884_s14  ;;  %p890_p1 = scmp.lt.s32.totalorder %s884_s14, %s884_s14 }
  0x3e   :  { %p891_p2 = por %p890_p1, %p889_p0 }
  0x40   :  { %p892_p3 = pnand %p891_p2, %p885_p13 }
  0x42   :  { %895 = shalt.err (!%p892_p3)
}
  0x43   :  { %73 = dma.hbm_to_vmem [thread:$0]  %s1134_s7, 2048, %s1023_s17, [#allocation9], %s928_s21, %s928_s21, %s929_s22  }
  0x44   :  { %918 = dma.done.wait [#allocation3], 2048  }
  0x45   :  { %919 = vsyncadd [#allocation3], 4294965248 }
  0x46   :  { %920 = dma.done.wait [#allocation6], 4096  }
  0x47   :  { %921 = vsyncadd [#allocation6], 4294963200 }
  0x48   :  { %922 = dma.done.wait [#allocation9], 2048  }
  0x49   :  { %923 = vsyncadd [#allocation9], 4294965248  ;;  %v932_v0 = vmov 0.0|0.0   ;;  %vm933_vm0 = vmmov 0   ;;  %v934_v1 = vmov 0.0   ;;  %v89_v2 = vld [vmem:[#allocation2] sm:$0xff] }
  0x4a   :  { %700 = vmatprep.subr.bf16.mxu0 %v932_v0  ;;  %592 = vmatprep.mubr.msk.f32.mxu0 %vm933_vm0, %v934_v1  ;;  %v90_v3 = vld [vmem:[#allocation2 + $0x8] sm:$0xff]  ;;  %v91_v4 = vld [vmem:[#allocation2 + $0x10] sm:$0xff]  ;;  %v92_v6 = vld [vmem:[#allocation2 + $0x18] sm:$0xff]  ;;  %s935_s20 = smov [#allocation10]  }
  0x4b   :  { %724 = vmatprep.subr.bf16.mxu1 %v932_v0  ;;  %627 = vmatprep.mubr.msk.f32.mxu1 %vm933_vm0, %v934_v1  ;;  %v701_v5 = vpack.c.bf16 %v90_v3, %v89_v2  ;;  %v704_v7 = vpack.c.bf16 %v92_v6, %v91_v4  ;;  %v93_v8 = vld [vmem:[#allocation2 + $0x20] sm:$0xff]  ;;  %v94_v9 = vld [vmem:[#allocation2 + $0x28] sm:$0xff]  ;;  %v185_v12 = vld [vmem:[#allocation5 + $0x10] sm:$0xff]  ;;  %s477_s23 = sshll.u32 %s935_s20, 4  ;;  %s478_s23 = int_to_ptr.vmem [resolvable:$true] %s477_s23 }
  0x4c   :  { %v183_v10 = vld [vmem:[#allocation5] sm:$0xff]  ;;  %v184_v11 = vld [vmem:[#allocation5 + $0x8] sm:$0xff]  ;;  %v186_v13 = vld [vmem:[#allocation5 + $0x18] sm:$0xff]  ;;  %v707_v14 = vpack.c.bf16 %v94_v9, %v93_v8  ;;  %p901_p5 = scmp.lt.s32.totalorder %s478_s23, %s478_s23 }
  0x4d   :  { %702 = vmatpush3.bf16.msra.mxu0 %v701_v5  ;;  %v725_v15 = vpack.c.bf16 %v184_v11, %v183_v10  ;;  %v95_v16 = vld [vmem:[#allocation2 + $0x30] sm:$0xff]  ;;  %v96_v17 = vld [vmem:[#allocation2 + $0x38] sm:$0xff]  ;;  %v728_v18 = vpack.c.bf16 %v186_v13, %v185_v12  ;;  %v187_v19 = vld [vmem:[#allocation5 + $0x20] sm:$0xff] }
  0x4e   :  { %703 = vmatprep.subr.bf16.mxu0 %v932_v0  ;;  %v188_v20 = vld [vmem:[#allocation5 + $0x28] sm:$0xff]  ;;  %v710_v21 = vpack.c.bf16 %v96_v17, %v95_v16  ;;  %v97_v22 = vld [vmem:[#allocation2 + $0x40] sm:$0xff]  ;;  %v189_v25 = vld [vmem:[#allocation5 + $0x30] sm:$0xff] }
  0x4f   :  { %726 = vmatpush3.bf16.msra.mxu1 %v725_v15  ;;  %v98_v23 = vld [vmem:[#allocation2 + $0x48] sm:$0xff]  ;;  %v731_v24 = vpack.c.bf16 %v188_v20, %v187_v19  ;;  %v190_v26 = vld [vmem:[#allocation5 + $0x38] sm:$0xff]  ;;  %v99_v28 = vld [vmem:[#allocation2 + $0x50] sm:$0xff] }
  0x50   :  { %727 = vmatprep.subr.bf16.mxu1 %v932_v0  ;;  %v713_v27 = vpack.c.bf16 %v98_v23, %v97_v22  ;;  %v100_v29 = vld [vmem:[#allocation2 + $0x58] sm:$0xff]  ;;  %v734_v30 = vpack.c.bf16 %v190_v26, %v189_v25  ;;  %v191_v31 = vld [vmem:[#allocation5 + $0x40] sm:$0xff]  ;;  %v192_v32 = vld [vmem:[#allocation5 + $0x48] sm:$0xff] }
  0x51   :  { %705 = vmatpush3.bf16.msra.mxu0 %v704_v7  ;;  %v716_v33 = vpack.c.bf16 %v100_v29, %v99_v28  ;;  %v101_v34 = vld [vmem:[#allocation2 + $0x60] sm:$0xff]  ;;  %v102_v35 = vld [vmem:[#allocation2 + $0x68] sm:$0xff]  ;;  %v737_v36 = vpack.c.bf16 %v192_v32, %v191_v31  ;;  %v193_v37 = vld [vmem:[#allocation5 + $0x50] sm:$0xff] }
  0x52   :  { %706 = vmatprep.subr.bf16.mxu0 %v932_v0  ;;  %v194_v38 = vld [vmem:[#allocation5 + $0x58] sm:$0xff]  ;;  %v719_v39 = vpack.c.bf16 %v102_v35, %v101_v34  ;;  %v103_v40 = vld [vmem:[#allocation2 + $0x70] sm:$0xff]  ;;  %v195_v43 = vld [vmem:[#allocation5 + $0x60] sm:$0xff] }
  0x53   :  { %729 = vmatpush3.bf16.msra.mxu1 %v728_v18  ;;  %v104_v41 = vld [vmem:[#allocation2 + $0x78] sm:$0xff]  ;;  %v740_v42 = vpack.c.bf16 %v194_v38, %v193_v37  ;;  %v196_v44 = vld [vmem:[#allocation5 + $0x68] sm:$0xff]  ;;  %v88_v47 = vld [vmem:[%s1127_s0] sm:$0xff] }
  0x54   :  { %730 = vmatprep.subr.bf16.mxu1 %v932_v0  ;;  %v722_v45 = vpack.c.bf16 %v104_v41, %v103_v40  ;;  %v743_v46 = vpack.c.bf16 %v196_v44, %v195_v43  ;;  %v197_v48 = vld [vmem:[#allocation5 + $0x70] sm:$0xff]  ;;  %v198_v49 = vld [vmem:[#allocation5 + $0x78] sm:$0xff]  ;;  %v277_v51 = vld [vmem:[#allocation7] sm:$0xff] }
  0x55   :  { %708 = vmatpush3.bf16.msra.mxu0 %v707_v14  ;;  %v746_v50 = vpack.c.bf16 %v198_v49, %v197_v48  ;;  %v278_v52 = vld [vmem:[#allocation7 + $0x8] sm:$0xff]  ;;  %v279_v53 = vld [vmem:[#allocation7 + $0x10] sm:$0xff]  ;;  %v280_v55 = vld [vmem:[#allocation7 + $0x18] sm:$0xff] }
  0x56   :  { %709 = vmatprep.subr.bf16.mxu0 %v932_v0  ;;  %v749_v54 = vpack.c.bf16 %v278_v52, %v277_v51  ;;  %v752_v56 = vpack.c.bf16 %v280_v55, %v279_v53  ;;  %v281_v57 = vld [vmem:[#allocation7 + $0x20] sm:$0xff]  ;;  %v282_v58 = vld [vmem:[#allocation7 + $0x28] sm:$0xff]  ;;  %v283_v60 = vld [vmem:[#allocation7 + $0x30] sm:$0xff] }
  0x57   :  { %732 = vmatpush3.bf16.msra.mxu1 %v731_v24  ;;  %v755_v59 = vpack.c.bf16 %v282_v58, %v281_v57  ;;  %v284_v61 = vld [vmem:[#allocation7 + $0x38] sm:$0xff]  ;;  %v285_v63 = vld [vmem:[#allocation7 + $0x40] sm:$0xff]  ;;  %v286_v2 = vld [vmem:[#allocation7 + $0x48] sm:$0xff] }
  0x58   :  { %733 = vmatprep.subr.bf16.mxu1 %v932_v0  ;;  %v758_v62 = vpack.c.bf16 %v284_v61, %v283_v60  ;;  %v761_v3 = vpack.c.bf16 %v286_v2, %v285_v63  ;;  %v287_v4 = vld [vmem:[#allocation7 + $0x50] sm:$0xff]  ;;  %v288_v5 = vld [vmem:[#allocation7 + $0x58] sm:$0xff]  ;;  %v289_v7 = vld [vmem:[#allocation7 + $0x60] sm:$0xff] }
  0x59   :  { %711 = vmatpush3.bf16.msra.mxu0 %v710_v21  ;;  %v764_v6 = vpack.c.bf16 %v288_v5, %v287_v4  ;;  %v290_v8 = vld [vmem:[#allocation7 + $0x68] sm:$0xff]  ;;  %v488_v10 = vld [vmem:[%s1129_s2] ss:$0 sm:$0xff]  ;;  %v291_v15 = vld [vmem:[#allocation7 + $0x70] sm:$0xff] }
  0x5a   :  { %712 = vmatprep.subr.bf16.mxu0 %v932_v0  ;;  %v767_v9 = vpack.c.bf16 %v290_v8, %v289_v7  ;;  %v292_v16 = vld [vmem:[#allocation7 + $0x78] sm:$0xff]  ;;  %v370_v18 = vld [vmem:[#allocation8] sm:$0xff]  ;;  %v371_v19 = vld [vmem:[#allocation8 + $0x8] sm:$0xff] }
  0x5b   :  { %735 = vmatpush3.bf16.msra.mxu1 %v734_v30  ;;  %v770_v17 = vpack.c.bf16 %v292_v16, %v291_v15  ;;  %v372_v20 = vld [vmem:[#allocation8 + $0x10] sm:$0xff]  ;;  %v773_v21 = vpack.c.bf16 %v371_v19, %v370_v18  ;;  %v373_v22 = vld [vmem:[#allocation8 + $0x18] sm:$0xff]  ;;  %v374_v24 = vld [vmem:[#allocation8 + $0x20] sm:$0xff] }
  0x5c   :  { %736 = vmatprep.subr.bf16.mxu1 %v932_v0  ;;  %v776_v23 = vpack.c.bf16 %v373_v22, %v372_v20  ;;  %v375_v25 = vld [vmem:[#allocation8 + $0x28] sm:$0xff]  ;;  %v378_v29 = vld [vmem:[#allocation8 + $0x40] sm:$0xff]  ;;  %v380_v32 = vld [vmem:[#allocation8 + $0x50] sm:$0xff] }
  0x5d   :  { %714 = vmatpush3.bf16.msra.mxu0 %v713_v27  ;;  %v779_v26 = vpack.c.bf16 %v375_v25, %v374_v24  ;;  %v377_v27 = vld [vmem:[#allocation8 + $0x38] sm:$0xff]  ;;  %v379_v30 = vld [vmem:[#allocation8 + $0x48] sm:$0xff]  ;;  %v382_v35 = vld [vmem:[#allocation8 + $0x60] sm:$0xff] }
  0x5e   :  { %715 = vmatprep.subr.bf16.mxu0 %v932_v0  ;;  %v785_v31 = vpack.c.bf16 %v379_v30, %v378_v29  ;;  %v489_v38 = vld [vmem:[%s1131_s4] ss:$0 sm:$0xff]  ;;  %v384_v43 = vld [vmem:[#allocation8 + $0x70] sm:$0xff]  ;;  %v385_v44 = vld [vmem:[#allocation8 + $0x78] sm:$0xff] }
  0x5f   :  { %738 = vmatpush3.bf16.msra.mxu1 %v737_v36  ;;  %v383_v36 = vld [vmem:[#allocation8 + $0x68] sm:$0xff] }
  0x60   :  { %739 = vmatprep.subr.bf16.mxu1 %v932_v0  ;;  %v791_v37 = vpack.c.bf16 %v383_v36, %v382_v35 }
  0x61   :  { %717 = vmatpush3.bf16.msra.mxu0 %v716_v33  ;;  %v381_v33 = vld [vmem:[#allocation8 + $0x58] sm:$0xff] }
  0x62   :  { %718 = vmatprep.subr.bf16.mxu0 %v932_v0  ;;  %v788_v34 = vpack.c.bf16 %v381_v33, %v380_v32 }
  0x63   :  { %741 = vmatpush3.bf16.msra.mxu1 %v740_v42 }
  0x64   :  { %742 = vmatprep.subr.bf16.mxu1 %v932_v0 }
  0x65   :  { %720 = vmatpush3.bf16.msra.mxu0 %v719_v39 }
  0x66   :  { %721 = vmatprep.subr.bf16.mxu0 %v932_v0 }
  0x67   :  { %744 = vmatpush3.bf16.msra.mxu1 %v743_v46  ;;  %v490_v46 = vld [vmem:[%s1133_s6] ss:$0 sm:$0xff]  ;;  %s896_s6 = scalar_lea.vmem %s478_s23, 128 }
  0x68   :  { %745 = vmatprep.subr.bf16.mxu1 %v932_v0  ;;  %p897_p4 = scmp.ne.s32.totalorder %s478_s23, %s896_s6  ;;  %p902_p6 = scmp.lt.s32.totalorder %s896_s6, %s896_s6 }
  0x69   :  { %723 = vmatpush3.bf16.msra.mxu0 %v722_v45  ;;  %v794_v45 = vpack.c.bf16 %v385_v44, %v384_v43 }
  0x6a   :  { %748 = vmatprep.subr.bf16.mxu0 %v932_v0  ;;  %p903_p7 = por %p902_p6, %p901_p5 }
  0x6b   :  { %747 = vmatpush3.bf16.msra.mxu1 %v746_v50  ;;  %v491_v50 = vld [vmem:[%s1135_s8] ss:$0 sm:$0xff] }
  0x6c   :  { %593 = vmatmul.mubr.f32.vlgmr.msra.gmra.mrb[0].mxu0 %v88_v47  ;;  %772 = vmatprep.subr.bf16.mxu1 %v932_v0  ;;  %p904_p8 = pnand %p903_p7, %p897_p4 }
  0x6d   :  { %662 = vmatprep.mubr.msk.f32.mxu0 %vm933_vm0, %v934_v1  ;;  %750 = vmatpush3.bf16.msra.mxu0 %v749_v54 }
  0x6e   :  { %751 = vmatprep.subr.bf16.mxu0 %v932_v0 }
  0x71   :  { %753 = vmatpush3.bf16.msra.mxu0 %v752_v56 }
  0x72   :  { %754 = vmatprep.subr.bf16.mxu0 %v932_v0 }
  0x75   :  { %756 = vmatpush3.bf16.msra.mxu0 %v755_v59 }
  0x76   :  { %757 = vmatprep.subr.bf16.mxu0 %v932_v0 }
  0x79   :  { %759 = vmatpush3.bf16.msra.mxu0 %v758_v62 }
  0x7a   :  { %760 = vmatprep.subr.bf16.mxu0 %v932_v0 }
  0x7d   :  { %762 = vmatpush3.bf16.msra.mxu0 %v761_v3 }
  0x7e   :  { %763 = vmatprep.subr.bf16.mxu0 %v932_v0 }
  0x81   :  { %765 = vmatpush3.bf16.msra.mxu0 %v764_v6 }
  0x82   :  { %766 = vmatprep.subr.bf16.mxu0 %v932_v0 }
  0x85   :  { %768 = vmatpush3.bf16.msra.mxu0 %v767_v9 }
  0x86   :  { %769 = vmatprep.subr.bf16.mxu0 %v932_v0 }
  0x89   :  { %771 = vmatpush3.bf16.msra.mxu0 %v770_v17 }
 0x13f   :  { %v178_v11 = vpop.f32.mrb[0].mxu0 }
 0x140   :  { %v179_v12 = vadd.f32 %v488_v10, %v178_v11  ;;  %v594_v13 = vpop.f32.mrb[1].mxu0 }
 0x142   :  { %v182_v14 = vmax.f32 %v179_v12, 0.0 }
 0x144   :  { %628 = vmatmul.mubr.f32.vlgmr.msra.gmra.mrb[0].mxu1 %v182_v14 }
 0x145   :  { %697 = vmatprep.mubr.msk.f32.mxu1 %vm933_vm0, %v934_v1  ;;  %774 = vmatpush3.bf16.msra.mxu1 %v773_v21  ;;  %v376_v1 = vld [vmem:[#allocation8 + $0x30] sm:$0xff] }
 0x146   :  { %775 = vmatprep.subr.bf16.mxu1 %v932_v0  ;;  %v782_v28 = vpack.c.bf16 %v377_v27, %v376_v1 }
 0x149   :  { %777 = vmatpush3.bf16.msra.mxu1 %v776_v23 }
 0x14a   :  { %778 = vmatprep.subr.bf16.mxu1 %v932_v0 }
 0x14d   :  { %780 = vmatpush3.bf16.msra.mxu1 %v779_v26 }
 0x14e   :  { %781 = vmatprep.subr.bf16.mxu1 %v932_v0 }
 0x151   :  { %783 = vmatpush3.bf16.msra.mxu1 %v782_v28 }
 0x152   :  { %784 = vmatprep.subr.bf16.mxu1 %v932_v0 }
 0x155   :  { %786 = vmatpush3.bf16.msra.mxu1 %v785_v31 }
 0x156   :  { %787 = vmatprep.subr.bf16.mxu1 %v932_v0 }
 0x159   :  { %789 = vmatpush3.bf16.msra.mxu1 %v788_v34 }
 0x15a   :  { %790 = vmatprep.subr.bf16.mxu1 %v932_v0 }
 0x15d   :  { %792 = vmatpush3.bf16.msra.mxu1 %v791_v37 }
 0x15e   :  { %793 = vmatprep.subr.bf16.mxu1 %v932_v0 }
 0x161   :  { %795 = vmatpush3.bf16.msra.mxu1 %v794_v45 }
 0x217   :  { %v272_v39 = vpop.f32.mrb[0].mxu1 }
 0x218   :  { %v273_v40 = vadd.f32 %v489_v38, %v272_v39  ;;  %v629_v41 = vpop.f32.mrb[1].mxu1 }
 0x21a   :  { %v276_v42 = vmax.f32 %v273_v40, 0.0 }
 0x21c   :  { %663 = vmatmul.mubr.f32.vlgmr.msra.gmra.mrb[2].mxu0 %v276_v42 }
 0x2ef   :  { %v366_v47 = vpop.f32.mrb[2].mxu0 }
 0x2f0   :  { %v367_v48 = vadd.f32 %v490_v46, %v366_v47  ;;  %v664_v0 = vpop.f32.mrb[3].mxu0 }
 0x2f2   :  { %v387_v49 = vmax.f32 %v367_v48, 0.0 }
 0x2f4   :  { %698 = vmatmul.mubr.f32.vlgmr.msra.gmra.mrb[2].mxu1 %v387_v49 }
 0x3c7   :  { %v460_v51 = vpop.f32.mrb[2].mxu1 }
 0x3c8   :  { %v461_v52 = vadd.f32 %v491_v50, %v460_v51  ;;  %v699_v53 = vpop.f32.mrb[3].mxu1 }
 0x3ca   :  { %v464_v54 = vmul.f32 %v461_v52, %v461_v52 }
 0x3cc   :  { %465 = vadd.xlane.f32.xlu0 %v464_v54 }
 0x459   :  { %v466_v55 = vpop.xlane.xlu0 %465 }
 0x45a   :  { %v467_v56 = vmax.f32 %v466_v55, 1e-24 }
 0x45c   :  { %806 = vrsqrt.f32 %v467_v56 }
 0x466   :  { %v807_v57 = vpop.eup %806 }
 0x467   :  { %v469_v58 = vmul.f32 %v807_v57, %v461_v52 }
 0x469   :  { %470 = vst [vmem:[#allocation10] sm:$0xff] %v469_v58 }
 0x46a   :  { %907 = shalt.err (!%p904_p8)
}
 0x46b   :  { %s908_s25 = scalar_lea.hbm %s1136_s9, 128 }
 0x46c   :  { %p909_p9 = scmp.ne.s32.totalorder %s1136_s9, %s908_s25  ;;  %p912_p10 = scmp.lt.u32.totalorder %s908_s25, %s1136_s9 }
 0x46e   :  { %p914_p11 = pnand %p912_p10, %p909_p9 }
 0x470   :  { %917 = shalt.err (!%p914_p11)
}
 0x471   :  { %480 = dma.vmem_to_hbm [thread:$0]  %s478_s23, 128, %s1136_s9, [#allocation4]  }
 0x472   :  { %924 = dma.done.wait [#allocation4], 128  }
 0x473   :  { %925 = vsyncadd [#allocation4], 4294967168 }
 0x474   :  { %484 = vsyncpa [#allocation3], 1 }
 0x475   :  { %485 = vsyncpa [#allocation6], 1 }
 0x476   :  { %486 = vsyncpa [#allocation9], 1 }
 0x477   :  { %487 = vsyncpa [#allocation4], 1 }

</bundles_post_ra>
